<compile_context>
chip_gen: v5e
topology: v5e:2x2
jax: 0.10.0
libtpu: 0.0.40
codegen_flags: <defaults>
</compile_context>

<pallas_src>
import functools

import jax
import jax.numpy as jnp
import numpy as np
from jax import lax
from jax.experimental import pallas as pl
from jax.experimental.pallas import tpu as pltpu


# ----------------------------- host-side helpers -----------------------------

def _linear_up_matrix(n_in, n_out):
    """1-D interpolation matrix for nn.Upsample(mode='bilinear', align_corners=True)."""
    u = np.zeros((n_out, n_in), np.float32)
    if n_in == 1:
        u[:, 0] = 1.0
        return u
    scale = (n_in - 1) / (n_out - 1)
    for i in range(n_out):
        src = i * scale
        i0 = min(int(np.floor(src)), n_in - 2)
        f = src - i0
        u[i, i0] = 1.0 - f
        u[i, i0 + 1] = f
    return u


def _tap_masks(hs, ws, dilations):
    """Validity masks (1.0/0.0) for each of the 9 taps of each dilation, flat (HWs,)."""
    hws = hs * ws
    p = np.arange(hws)
    hh, ww = p // ws, p % ws
    rows = []
    for dil in dilations:
        for ky in range(3):
            dy = (ky - 1) * dil
            for kx in range(3):
                dx = (kx - 1) * dil
                valid = (hh + dy >= 0) & (hh + dy < hs) & (ww + dx >= 0) & (ww + dx < ws)
                rows.append(valid.astype(np.float32))
    return np.stack(rows, axis=0)  # (len(dilations)*9, HWs)


# --------------------------------- the kernel --------------------------------

def _shift_flat(x, off, n):
    """xs[:, q] = x[:, q + off] for q+off in [0, n), zero elsewhere (static slices)."""
    if off == 0:
        return x
    if abs(off) >= n:  # tap fully out of range; its mask is all-zero anyway
        return jnp.zeros_like(x)
    k = abs(off)
    pad = jnp.zeros((x.shape[0], k), x.dtype)
    if off > 0:
        return jnp.concatenate([x[:, k:], pad], axis=1)
    return jnp.concatenate([pad, x[:, : n - k]], axis=1)


def _fused_kernel(x2_ref, x3_ref, wa1_ref, wa3_ref, wa5_ref, wc_ref, btot_ref,
                  up_t_ref, masks_ref, o_ref, xcat_ref, *, tb, c, c2, hs, ws):
    hws = hs * ws
    n = tb * hws  # lane width of the batched block

    # Bias folding: last scratch row is all-ones; the last column of each flattened
    # conv weight holds its bias.  One single-row write per grid step.
    xcat_ref[9 * c2:9 * c2 + 1, :] = jnp.ones((1, n), jnp.float32)

    def dconv_relu(x, w_ref, dil, d_idx):
        # x: (C2, tb*HWs), batch concatenated along lanes.
        # Write the 9 shifted+masked taps into static row slices of the VMEM scratch
        # (no concatenate copy), then ONE matmul per dilation, lane-dense N = tb*HWs.
        # Any flat shift that crosses a batch boundary is an out-of-row/col tap and is
        # zeroed by the (tb-tiled) mask, so the batched shift is exact.
        for ky in range(3):
            for kx in range(3):
                t = ky * 3 + kx
                off = (ky - 1) * dil * ws + (kx - 1) * dil
                xs = _shift_flat(x, off, n)
                row = d_idx * 9 + t
                xcat_ref[t * c2:(t + 1) * c2, :] = xs * masks_ref[row:row + 1, :]
        y = jnp.dot(w_ref[...], xcat_ref[...], preferred_element_type=jnp.float32)
        return jnp.maximum(y, 0.0)  # bias already included via the ones row

    x3 = x3_ref[...]                                  # (C2, tb*HWs)
    y1 = dconv_relu(x3, wa1_ref, 1, 0)
    y2 = dconv_relu(y1, wa3_ref, 3, 1)
    y3 = dconv_relu(y2, wa5_ref, 5, 2)
    s = x3 + y1 + y2 + y3                             # fused 4x shared conv3_1 input

    # Fused 1x1 (conv33 o conv3_1) at LOW resolution over the whole batched block.
    r = jnp.dot(wc_ref[...], s, preferred_element_type=jnp.float32)      # (C, tb*HWs)
    # Restack batches onto sublanes: (C, tb*HWs) -> (tb*C, HWs), then ONE stacked
    # upsample matmul with M = tb*C instead of tb matmuls with M = C.
    if tb > 1:
        r = jnp.concatenate([r[:, i * hws:(i + 1) * hws] for i in range(tb)], axis=0)
    u = jnp.dot(r, up_t_ref[...], preferred_element_type=jnp.float32)    # (tb*C, HW)
    x33 = jnp.maximum(u + btot_ref[...], 0.0)
    # Fully lane- and sublane-dense (tb*C, HW) add + store.
    o_ref[...] = (x2_ref[...] + x33).astype(o_ref.dtype)


# --------------------------------- the wrapper --------------------------------

def newmodel_011_forward(x2, x3, params, tb=None):
    """x2: (B, C, H, W); x3: (B, 2C, H/2, W/2). Weights in PyTorch layouts (1x1 squeezed)."""
    b, c, h, w = x2.shape
    b3, c2, hs, ws = x3.shape
    assert b3 == b and c2 == 2 * c and h == 2 * hs and w == 2 * ws
    hw, hws = h * w, hs * ws
    assert hw % 128 == 0, "pad H*W to a multiple of 128 for unmasked stores"

    if tb is None:
        # Lane density first: smallest divisor of B with tb*HWs >= 128 keeps every
        # vreg / MXU push fully lane-dense.  On v7x, override tb (e.g. tb = b // 2)
        # to lengthen the grid so "parallel" can shard across the two TensorCores.
        tb = b
        for d in range(1, b + 1):
            if b % d == 0 and d * hws >= 128:
                tb = d
                break
    assert b % tb == 0
    grid = (b // tb,)
    assert (tb * hws) % 128 == 0 or tb == b

    w31, b31 = params["conv3_1"]       # (2C, 2C), (2C,)
    wd1, bd1 = params["conv3_3_1"]     # (2C, 2C, 3, 3), (2C,)
    wd3, bd3 = params["conv3_3_3"]
    wd5, bd5 = params["conv3_3_5"]
    w33, b33 = params["conv33"]        # (C, 2C), (C,)

    def flat_w_aug(wd, bb):            # (Cout, Cin, 3, 3) -> (Cout, 9*Cin + 1), tap-major
        co, ci = wd.shape[:2]
        wf = jnp.transpose(wd, (0, 2, 3, 1)).reshape(co, 9 * ci)
        return jnp.concatenate([wf, bb.reshape(co, 1)], axis=1)   # bias in last column

    # Host-side algebraic fusion: conv33 o conv3_1 (both 1x1) and the 4 shared biases.
    wc = w33 @ w31                                        # (C, 2C)
    b_tot = (4.0 * (w33 @ b31) + b33).reshape(c, 1)       # (C, 1)
    btot_tiled = jnp.tile(b_tot, (tb, 1))                 # (tb*C, 1), batch-major rows

    # align_corners=True bilinear 2x upsample as a matmul: u = r_lowres @ up_t
    u_h = _linear_up_matrix(hs, h)
    u_w = _linear_up_matrix(ws, w)
    up_t = jnp.asarray(np.kron(u_h, u_w).T)               # (HWs, HW)
    masks = jnp.asarray(np.tile(_tap_masks(hs, ws, (1, 3, 5)), (1, tb)))  # (27, tb*HWs)

    # x2 / out as (B*C, HW): sublane+lane dense blocks.  x3 with batch on lanes.
    x2f = x2.reshape(b * c, hw)
    x3f = jnp.transpose(x3.reshape(b, c2, hws), (1, 0, 2)).reshape(c2, b * hws)

    kernel = functools.partial(_fused_kernel, tb=tb, c=c, c2=c2, hs=hs, ws=ws)
    const = lambda shape: pl.BlockSpec(shape, lambda g: (0, 0))   # resident, no re-DMA

    out = pl.pallas_call(
        kernel,
        out_shape=jax.ShapeDtypeStruct((b * c, hw), x2.dtype),
        grid_spec=pltpu.PrefetchScalarGridSpec(
            num_scalar_prefetch=0,
            grid=grid,
            in_specs=[
                pl.BlockSpec((tb * c, hw), lambda g: (g, 0)),       # x2   (B*C, HW)
                pl.BlockSpec((c2, tb * hws), lambda g: (0, g)),     # x3   (C2, B*HWs)
                const((c2, 9 * c2 + 1)),                            # dil=1 weight+bias
                const((c2, 9 * c2 + 1)),                            # dil=3 weight+bias
                const((c2, 9 * c2 + 1)),                            # dil=5 weight+bias
                const((c, c2)),                                     # fused 1x1 weight
                const((tb * c, 1)),                                 # fused bias (tiled)
                const((hws, hw)),                                   # upsample matrix
                const((27, tb * hws)),                              # tap masks (tiled)
            ],
            out_specs=pl.BlockSpec((tb * c, hw), lambda g: (g, 0)),
            scratch_shapes=[pltpu.VMEM((9 * c2 + 1, tb * hws), jnp.float32)],
        ),
        compiler_params=pltpu.CompilerParams(dimension_semantics=("parallel",)),
    )(x2f, x3f,
      flat_w_aug(wd1, bd1), flat_w_aug(wd3, bd3), flat_w_aug(wd5, bd5),
      wc, btot_tiled, up_t, masks)
    return out.reshape(b, c, h, w)


# ----------------------------- pure-JAX reference -----------------------------

def newmodel_011_ref(x2, x3, params):
    w31, b31 = params["conv3_1"]
    wd1, bd1 = params["conv3_3_1"]
    wd3, bd3 = params["conv3_3_3"]
    wd5, bd5 = params["conv3_3_5"]
    w33, b33 = params["conv33"]
    hp = lax.Precision.HIGHEST

    def conv3x3(x, wt, bb, dil):
        y = lax.conv_general_dilated(
            x, wt, window_strides=(1, 1), padding=((dil, dil), (dil, dil)),
            rhs_dilation=(dil, dil), dimension_numbers=("NCHW", "OIHW", "NCHW"),
            precision=hp)
        return y + bb[None, :, None, None]

    def conv1x1(x, wt, bb):
        return jnp.einsum("oc,bchw->bohw", wt, x, precision=hp) + bb[None, :, None, None]

    y1 = jax.nn.relu(conv3x3(x3, wd1, bd1, 1))
    y2 = jax.nn.relu(conv3x3(y1, wd3, bd3, 3))
    y3 = jax.nn.relu(conv3x3(y2, wd5, bd5, 5))
    ssum = (conv1x1(x3, w31, b31) + conv1x1(y1, w31, b31)
            + conv1x1(y2, w31, b31) + conv1x1(y3, w31, b31))

    _, _, hs, ws = x3.shape
    u_h = jnp.asarray(_linear_up_matrix(hs, 2 * hs))
    u_w = jnp.asarray(_linear_up_matrix(ws, 2 * ws))
    up = jnp.einsum("hp,bcpq,wq->bchw", u_h, ssum, u_w, precision=hp)
    x33 = jax.nn.relu(jnp.einsum("oc,bchw->bohw", w33, up, precision=hp)
                      + b33[None, :, None, None])
    return x2 + x33


if __name__ == "__main__":
    key = jax.random.PRNGKey(0)
    C = 4                     # out_channels
    B, H, W = 2, 16, 16
    Hs, Ws = H // 2, W // 2
    C2 = 2 * C

    ks = jax.random.split(key, 12)
    x2 = jax.random.normal(ks[0], (B, C, H, W), jnp.float32)
    x3 = jax.random.normal(ks[1], (B, C2, Hs, Ws), jnp.float32)

    def mk(kw, kb, shape_w, shape_b):
        return (0.1 * jax.random.normal(kw, shape_w, jnp.float32),
                0.1 * jax.random.normal(kb, shape_b, jnp.float32))

    params = {
        # PyTorch Conv2d(kernel_size=1) weights are (Cout, Cin, 1, 1); stored squeezed.
        "conv3_1": mk(ks[2], ks[3], (C2, C2), (C2,)),
        "conv3_3_1": mk(ks[4], ks[5], (C2, C2, 3, 3), (C2,)),
        "conv3_3_3": mk(ks[6], ks[7], (C2, C2, 3, 3), (C2,)),
        "conv3_3_5": mk(ks[8], ks[9], (C2, C2, 3, 3), (C2,)),
        "conv33": mk(ks[10], ks[11], (C, C2), (C,)),
    }

    out = newmodel_011_forward(x2, x3, params)
    jax.block_until_ready(out)

    ref = newmodel_011_ref(x2, x3, params)
    assert out.shape == (B, C, H, W) and out.dtype == jnp.float32
    err = float(jnp.max(jnp.abs(out - ref)))
    assert jnp.allclose(out, ref, atol=1e-3, rtol=1e-3), err

    print("KERNEL_OK")
</pallas_src>

<mosaic_0001>
module attributes {stable_mosaic.version = 11 : i64} {
  func.func @_fused_kernel(%arg0: i32, %arg1: memref<8x256xf32, #tpu.memory_space<vmem>>, %arg2: memref<8x128xf32, #tpu.memory_space<vmem>>, %arg3: memref<8x73xf32, #tpu.memory_space<vmem>>, %arg4: memref<8x73xf32, #tpu.memory_space<vmem>>, %arg5: memref<8x73xf32, #tpu.memory_space<vmem>>, %arg6: memref<4x8xf32, #tpu.memory_space<vmem>>, %arg7: memref<8x1xf32, #tpu.memory_space<vmem>>, %arg8: memref<64x256xf32, #tpu.memory_space<vmem>>, %arg9: memref<27x128xf32, #tpu.memory_space<vmem>>, %arg10: memref<8x256xf32, #tpu.memory_space<vmem>>, %arg11: memref<73x128xf32, #tpu.memory_space<vmem>>) attributes {dimension_semantics = [#tpu.dimension_semantics<parallel>], iteration_bounds = array<i64: 1>, scalar_prefetch = 0 : i64, scratch_operands = 1 : i64, tpu.core_type = #tpu.core_type<tc>, window_params = [{transform_indices = @transform_0, window_bounds = array<i64: 8, 256>}, {transform_indices = @transform_1, window_bounds = array<i64: 8, 128>}, {pipeline_mode = #tpu.pipeline_mode<synchronous>, transform_indices = @transform_2, window_bounds = array<i64: 8, 73>}, {pipeline_mode = #tpu.pipeline_mode<synchronous>, transform_indices = @transform_3, window_bounds = array<i64: 8, 73>}, {pipeline_mode = #tpu.pipeline_mode<synchronous>, transform_indices = @transform_4, window_bounds = array<i64: 8, 73>}, {pipeline_mode = #tpu.pipeline_mode<synchronous>, transform_indices = @transform_5, window_bounds = array<i64: 4, 8>}, {pipeline_mode = #tpu.pipeline_mode<synchronous>, transform_indices = @transform_6, window_bounds = array<i64: 8, 1>}, {pipeline_mode = #tpu.pipeline_mode<synchronous>, transform_indices = @transform_7, window_bounds = array<i64: 64, 256>}, {pipeline_mode = #tpu.pipeline_mode<synchronous>, transform_indices = @transform_8, window_bounds = array<i64: 27, 128>}, {transform_indices = @transform_9, window_bounds = array<i64: 8, 256>}]} {
    %cst = arith.constant 1.000000e+00 : f32
    %0 = vector.broadcast %cst : f32 to vector<1x128xf32>
    %c72 = arith.constant 72 : index
    %c0 = arith.constant 0 : index
    %1 = vector.load %arg11[%c72, %c0] : memref<73x128xf32, #tpu.memory_space<vmem>>, vector<1x128xf32>
    tpu.vector_store %arg11[%c72, %c0], %0 {strides = array<i32>} : memref<73x128xf32, #tpu.memory_space<vmem>>, vector<1x128xf32>,
    %c0_0 = arith.constant 0 : index
    %c0_1 = arith.constant 0 : index
    %2 = vector.load %arg2[%c0_0, %c0_1] : memref<8x128xf32, #tpu.memory_space<vmem>>, vector<8x128xf32>
    %cst_2 = arith.constant 0.000000e+00 : f32
    %3 = vector.broadcast %cst_2 : f32 to vector<8x9xf32>
    %4 = vector.extract_strided_slice %2 {offsets = [0, 0], sizes = [8, 119], strides = [1, 1]} : vector<8x128xf32> to vector<8x119xf32>
    %5 = tpu.concatenate %3, %4 in 1 : vector<8x9xf32>, vector<8x119xf32> -> vector<8x128xf32>
    %c0_3 = arith.constant 0 : index
    %c0_4 = arith.constant 0 : index
    %6 = vector.load %arg9[%c0_3, %c0_4] : memref<27x128xf32, #tpu.memory_space<vmem>>, vector<1x128xf32>
    %7 = vector.broadcast %6 : vector<1x128xf32> to vector<8x128xf32>
    %8 = arith.mulf %5, %7 : vector<8x128xf32>
    %c0_5 = arith.constant 0 : index
    %c0_6 = arith.constant 0 : index
    %9 = vector.load %arg11[%c0_5, %c0_6] : memref<73x128xf32, #tpu.memory_space<vmem>>, vector<8x128xf32>
    tpu.vector_store %arg11[%c0_5, %c0_6], %8 {strides = array<i32>} : memref<73x128xf32, #tpu.memory_space<vmem>>, vector<8x128xf32>,
    %cst_7 = arith.constant 0.000000e+00 : f32
    %10 = vector.broadcast %cst_7 : f32 to vector<8x8xf32>
    %11 = vector.extract_strided_slice %2 {offsets = [0, 0], sizes = [8, 120], strides = [1, 1]} : vector<8x128xf32> to vector<8x120xf32>
    %12 = tpu.concatenate %10, %11 in 1 : vector<8x8xf32>, vector<8x120xf32> -> vector<8x128xf32>
    %c1 = arith.constant 1 : index
    %c0_8 = arith.constant 0 : index
    %13 = vector.load %arg9[%c1, %c0_8] : memref<27x128xf32, #tpu.memory_space<vmem>>, vector<1x128xf32>
    %14 = vector.broadcast %13 : vector<1x128xf32> to vector<8x128xf32>
    %15 = arith.mulf %12, %14 : vector<8x128xf32>
    %c8 = arith.constant 8 : index
    %c0_9 = arith.constant 0 : index
    %16 = vector.load %arg11[%c8, %c0_9] : memref<73x128xf32, #tpu.memory_space<vmem>>, vector<8x128xf32>
    tpu.vector_store %arg11[%c8, %c0_9], %15 {strides = array<i32>} : memref<73x128xf32, #tpu.memory_space<vmem>>, vector<8x128xf32>,
    %cst_10 = arith.constant 0.000000e+00 : f32
    %17 = vector.broadcast %cst_10 : f32 to vector<8x7xf32>
    %18 = vector.extract_strided_slice %2 {offsets = [0, 0], sizes = [8, 121], strides = [1, 1]} : vector<8x128xf32> to vector<8x121xf32>
    %19 = tpu.concatenate %17, %18 in 1 : vector<8x7xf32>, vector<8x121xf32> -> vector<8x128xf32>
    %c2 = arith.constant 2 : index
    %c0_11 = arith.constant 0 : index
    %20 = vector.load %arg9[%c2, %c0_11] : memref<27x128xf32, #tpu.memory_space<vmem>>, vector<1x128xf32>
    %21 = vector.broadcast %20 : vector<1x128xf32> to vector<8x128xf32>
    %22 = arith.mulf %19, %21 : vector<8x128xf32>
    %c16 = arith.constant 16 : index
    %c0_12 = arith.constant 0 : index
    %23 = vector.load %arg11[%c16, %c0_12] : memref<73x128xf32, #tpu.memory_space<vmem>>, vector<8x128xf32>
    tpu.vector_store %arg11[%c16, %c0_12], %22 {strides = array<i32>} : memref<73x128xf32, #tpu.memory_space<vmem>>, vector<8x128xf32>,
    %cst_13 = arith.constant 0.000000e+00 : f32
    %24 = vector.broadcast %cst_13 : f32 to vector<8x1xf32>
    %25 = vector.extract_strided_slice %2 {offsets = [0, 0], sizes = [8, 127], strides = [1, 1]} : vector<8x128xf32> to vector<8x127xf32>
    %26 = tpu.concatenate %24, %25 in 1 : vector<8x1xf32>, vector<8x127xf32> -> vector<8x128xf32>
    %c3 = arith.constant 3 : index
    %c0_14 = arith.constant 0 : index
    %27 = vector.load %arg9[%c3, %c0_14] : memref<27x128xf32, #tpu.memory_space<vmem>>, vector<1x128xf32>
    %28 = vector.broadcast %27 : vector<1x128xf32> to vector<8x128xf32>
    %29 = arith.mulf %26, %28 : vector<8x128xf32>
    %c24 = arith.constant 24 : index
    %c0_15 = arith.constant 0 : index
    %30 = vector.load %arg11[%c24, %c0_15] : memref<73x128xf32, #tpu.memory_space<vmem>>, vector<8x128xf32>
    tpu.vector_store %arg11[%c24, %c0_15], %29 {strides = array<i32>} : memref<73x128xf32, #tpu.memory_space<vmem>>, vector<8x128xf32>,
    %c4 = arith.constant 4 : index
    %c0_16 = arith.constant 0 : index
    %31 = vector.load %arg9[%c4, %c0_16] : memref<27x128xf32, #tpu.memory_space<vmem>>, vector<1x128xf32>
    %32 = vector.broadcast %31 : vector<1x128xf32> to vector<8x128xf32>
    %33 = arith.mulf %2, %32 : vector<8x128xf32>
    %c32 = arith.constant 32 : index
    %c0_17 = arith.constant 0 : index
    %34 = vector.load %arg11[%c32, %c0_17] : memref<73x128xf32, #tpu.memory_space<vmem>>, vector<8x128xf32>
    tpu.vector_store %arg11[%c32, %c0_17], %33 {strides = array<i32>} : memref<73x128xf32, #tpu.memory_space<vmem>>, vector<8x128xf32>,
    %cst_18 = arith.constant 0.000000e+00 : f32
    %35 = vector.broadcast %cst_18 : f32 to vector<8x1xf32>
    %36 = vector.extract_strided_slice %2 {offsets = [0, 1], sizes = [8, 127], strides = [1, 1]} : vector<8x128xf32> to vector<8x127xf32>
    %37 = tpu.concatenate %36, %35 in 1 : vector<8x127xf32>, vector<8x1xf32> -> vector<8x128xf32>
    %c5 = arith.constant 5 : index
    %c0_19 = arith.constant 0 : index
    %38 = vector.load %arg9[%c5, %c0_19] : memref<27x128xf32, #tpu.memory_space<vmem>>, vector<1x128xf32>
    %39 = vector.broadcast %38 : vector<1x128xf32> to vector<8x128xf32>
    %40 = arith.mulf %37, %39 : vector<8x128xf32>
    %c40 = arith.constant 40 : index
    %c0_20 = arith.constant 0 : index
    %41 = vector.load %arg11[%c40, %c0_20] : memref<73x128xf32, #tpu.memory_space<vmem>>, vector<8x128xf32>
    tpu.vector_store %arg11[%c40, %c0_20], %40 {strides = array<i32>} : memref<73x128xf32, #tpu.memory_space<vmem>>, vector<8x128xf32>,
    %cst_21 = arith.constant 0.000000e+00 : f32
    %42 = vector.broadcast %cst_21 : f32 to vector<8x7xf32>
    %43 = vector.extract_strided_slice %2 {offsets = [0, 7], sizes = [8, 121], strides = [1, 1]} : vector<8x128xf32> to vector<8x121xf32>
    %44 = tpu.concatenate %43, %42 in 1 : vector<8x121xf32>, vector<8x7xf32> -> vector<8x128xf32>
    %c6 = arith.constant 6 : index
    %c0_22 = arith.constant 0 : index
    %45 = vector.load %arg9[%c6, %c0_22] : memref<27x128xf32, #tpu.memory_space<vmem>>, vector<1x128xf32>
    %46 = vector.broadcast %45 : vector<1x128xf32> to vector<8x128xf32>
    %47 = arith.mulf %44, %46 : vector<8x128xf32>
    %c48 = arith.constant 48 : index
    %c0_23 = arith.constant 0 : index
    %48 = vector.load %arg11[%c48, %c0_23] : memref<73x128xf32, #tpu.memory_space<vmem>>, vector<8x128xf32>
    tpu.vector_store %arg11[%c48, %c0_23], %47 {strides = array<i32>} : memref<73x128xf32, #tpu.memory_space<vmem>>, vector<8x128xf32>,
    %cst_24 = arith.constant 0.000000e+00 : f32
    %49 = vector.broadcast %cst_24 : f32 to vector<8x8xf32>
    %50 = vector.extract_strided_slice %2 {offsets = [0, 8], sizes = [8, 120], strides = [1, 1]} : vector<8x128xf32> to vector<8x120xf32>
    %51 = tpu.concatenate %50, %49 in 1 : vector<8x120xf32>, vector<8x8xf32> -> vector<8x128xf32>
    %c7 = arith.constant 7 : index
    %c0_25 = arith.constant 0 : index
    %52 = vector.load %arg9[%c7, %c0_25] : memref<27x128xf32, #tpu.memory_space<vmem>>, vector<1x128xf32>
    %53 = vector.broadcast %52 : vector<1x128xf32> to vector<8x128xf32>
    %54 = arith.mulf %51, %53 : vector<8x128xf32>
    %c56 = arith.constant 56 : index
    %c0_26 = arith.constant 0 : index
    %55 = vector.load %arg11[%c56, %c0_26] : memref<73x128xf32, #tpu.memory_space<vmem>>, vector<8x128xf32>
    tpu.vector_store %arg11[%c56, %c0_26], %54 {strides = array<i32>} : memref<73x128xf32, #tpu.memory_space<vmem>>, vector<8x128xf32>,
    %cst_27 = arith.constant 0.000000e+00 : f32
    %56 = vector.broadcast %cst_27 : f32 to vector<8x9xf32>
    %57 = vector.extract_strided_slice %2 {offsets = [0, 9], sizes = [8, 119], strides = [1, 1]} : vector<8x128xf32> to vector<8x119xf32>
    %58 = tpu.concatenate %57, %56 in 1 : vector<8x119xf32>, vector<8x9xf32> -> vector<8x128xf32>
    %c8_28 = arith.constant 8 : index
    %c0_29 = arith.constant 0 : index
    %59 = vector.load %arg9[%c8_28, %c0_29] : memref<27x128xf32, #tpu.memory_space<vmem>>, vector<1x128xf32>
    %60 = vector.broadcast %59 : vector<1x128xf32> to vector<8x128xf32>
    %61 = arith.mulf %58, %60 : vector<8x128xf32>
    %c64 = arith.constant 64 : index
    %c0_30 = arith.constant 0 : index
    %62 = vector.load %arg11[%c64, %c0_30] : memref<73x128xf32, #tpu.memory_space<vmem>>, vector<8x128xf32>
    tpu.vector_store %arg11[%c64, %c0_30], %61 {strides = array<i32>} : memref<73x128xf32, #tpu.memory_space<vmem>>, vector<8x128xf32>,
    %c0_31 = arith.constant 0 : index
    %c0_32 = arith.constant 0 : index
    %63 = vector.load %arg3[%c0_31, %c0_32] : memref<8x73xf32, #tpu.memory_space<vmem>>, vector<8x73xf32>
    %c0_33 = arith.constant 0 : index
    %c0_34 = arith.constant 0 : index
    %64 = vector.load %arg11[%c0_33, %c0_34] : memref<73x128xf32, #tpu.memory_space<vmem>>, vector<73x128xf32>
    %cst_35 = arith.constant dense<0.000000e+00> : vector<8x128xf32>
    %65 = tpu.matmul %63, %64, %cst_35 {dimension_numbers = #tpu.dot_dimension_numbers<[1], [0], [0], [1], [0, 0, 1, 1], [], []>} : vector<8x73xf32>, vector<73x128xf32>, vector<8x128xf32> -> vector<8x128xf32>
    %cst_36 = arith.constant 0.000000e+00 : f32
    %66 = vector.broadcast %cst_36 : f32 to vector<8x128xf32>
    %67 = arith.maximumf %65, %66 : vector<8x128xf32>
    %cst_37 = arith.constant 0.000000e+00 : f32
    %68 = vector.broadcast %cst_37 : f32 to vector<8x27xf32>
    %69 = vector.extract_strided_slice %67 {offsets = [0, 0], sizes = [8, 101], strides = [1, 1]} : vector<8x128xf32> to vector<8x101xf32>
    %70 = tpu.concatenate %68, %69 in 1 : vector<8x27xf32>, vector<8x101xf32> -> vector<8x128xf32>
    %c9 = arith.constant 9 : index
    %c0_38 = arith.constant 0 : index
    %71 = vector.load %arg9[%c9, %c0_38] : memref<27x128xf32, #tpu.memory_space<vmem>>, vector<1x128xf32>
    %72 = vector.broadcast %71 : vector<1x128xf32> to vector<8x128xf32>
    %73 = arith.mulf %70, %72 : vector<8x128xf32>
    %c0_39 = arith.constant 0 : index
    %c0_40 = arith.constant 0 : index
    %74 = vector.load %arg11[%c0_39, %c0_40] : memref<73x128xf32, #tpu.memory_space<vmem>>, vector<8x128xf32>
    tpu.vector_store %arg11[%c0_39, %c0_40], %73 {strides = array<i32>} : memref<73x128xf32, #tpu.memory_space<vmem>>, vector<8x128xf32>,
    %cst_41 = arith.constant 0.000000e+00 : f32
    %75 = vector.broadcast %cst_41 : f32 to vector<8x24xf32>
    %76 = vector.extract_strided_slice %67 {offsets = [0, 0], sizes = [8, 104], strides = [1, 1]} : vector<8x128xf32> to vector<8x104xf32>
    %77 = tpu.concatenate %75, %76 in 1 : vector<8x24xf32>, vector<8x104xf32> -> vector<8x128xf32>
    %c10 = arith.constant 10 : index
    %c0_42 = arith.constant 0 : index
    %78 = vector.load %arg9[%c10, %c0_42] : memref<27x128xf32, #tpu.memory_space<vmem>>, vector<1x128xf32>
    %79 = vector.broadcast %78 : vector<1x128xf32> to vector<8x128xf32>
    %80 = arith.mulf %77, %79 : vector<8x128xf32>
    %c8_43 = arith.constant 8 : index
    %c0_44 = arith.constant 0 : index
    %81 = vector.load %arg11[%c8_43, %c0_44] : memref<73x128xf32, #tpu.memory_space<vmem>>, vector<8x128xf32>
    tpu.vector_store %arg11[%c8_43, %c0_44], %80 {strides = array<i32>} : memref<73x128xf32, #tpu.memory_space<vmem>>, vector<8x128xf32>,
    %cst_45 = arith.constant 0.000000e+00 : f32
    %82 = vector.broadcast %cst_45 : f32 to vector<8x21xf32>
    %83 = vector.extract_strided_slice %67 {offsets = [0, 0], sizes = [8, 107], strides = [1, 1]} : vector<8x128xf32> to vector<8x107xf32>
    %84 = tpu.concatenate %82, %83 in 1 : vector<8x21xf32>, vector<8x107xf32> -> vector<8x128xf32>
    %c11 = arith.constant 11 : index
    %c0_46 = arith.constant 0 : index
    %85 = vector.load %arg9[%c11, %c0_46] : memref<27x128xf32, #tpu.memory_space<vmem>>, vector<1x128xf32>
    %86 = vector.broadcast %85 : vector<1x128xf32> to vector<8x128xf32>
    %87 = arith.mulf %84, %86 : vector<8x128xf32>
    %c16_47 = arith.constant 16 : index
    %c0_48 = arith.constant 0 : index
    %88 = vector.load %arg11[%c16_47, %c0_48] : memref<73x128xf32, #tpu.memory_space<vmem>>, vector<8x128xf32>
    tpu.vector_store %arg11[%c16_47, %c0_48], %87 {strides = array<i32>} : memref<73x128xf32, #tpu.memory_space<vmem>>, vector<8x128xf32>,
    %cst_49 = arith.constant 0.000000e+00 : f32
    %89 = vector.broadcast %cst_49 : f32 to vector<8x3xf32>
    %90 = vector.extract_strided_slice %67 {offsets = [0, 0], sizes = [8, 125], strides = [1, 1]} : vector<8x128xf32> to vector<8x125xf32>
    %91 = tpu.concatenate %89, %90 in 1 : vector<8x3xf32>, vector<8x125xf32> -> vector<8x128xf32>
    %c12 = arith.constant 12 : index
    %c0_50 = arith.constant 0 : index
    %92 = vector.load %arg9[%c12, %c0_50] : memref<27x128xf32, #tpu.memory_space<vmem>>, vector<1x128xf32>
    %93 = vector.broadcast %92 : vector<1x128xf32> to vector<8x128xf32>
    %94 = arith.mulf %91, %93 : vector<8x128xf32>
    %c24_51 = arith.constant 24 : index
    %c0_52 = arith.constant 0 : index
    %95 = vector.load %arg11[%c24_51, %c0_52] : memref<73x128xf32, #tpu.memory_space<vmem>>, vector<8x128xf32>
    tpu.vector_store %arg11[%c24_51, %c0_52], %94 {strides = array<i32>} : memref<73x128xf32, #tpu.memory_space<vmem>>, vector<8x128xf32>,
    %c13 = arith.constant 13 : index
    %c0_53 = arith.constant 0 : index
    %96 = vector.load %arg9[%c13, %c0_53] : memref<27x128xf32, #tpu.memory_space<vmem>>, vector<1x128xf32>
    %97 = vector.broadcast %96 : vector<1x128xf32> to vector<8x128xf32>
    %98 = arith.mulf %67, %97 : vector<8x128xf32>
    %c32_54 = arith.constant 32 : index
    %c0_55 = arith.constant 0 : index
    %99 = vector.load %arg11[%c32_54, %c0_55] : memref<73x128xf32, #tpu.memory_space<vmem>>, vector<8x128xf32>
    tpu.vector_store %arg11[%c32_54, %c0_55], %98 {strides = array<i32>} : memref<73x128xf32, #tpu.memory_space<vmem>>, vector<8x128xf32>,
    %cst_56 = arith.constant 0.000000e+00 : f32
    %100 = vector.broadcast %cst_56 : f32 to vector<8x3xf32>
    %101 = vector.extract_strided_slice %67 {offsets = [0, 3], sizes = [8, 125], strides = [1, 1]} : vector<8x128xf32> to vector<8x125xf32>
    %102 = tpu.concatenate %101, %100 in 1 : vector<8x125xf32>, vector<8x3xf32> -> vector<8x128xf32>
    %c14 = arith.constant 14 : index
    %c0_57 = arith.constant 0 : index
    %103 = vector.load %arg9[%c14, %c0_57] : memref<27x128xf32, #tpu.memory_space<vmem>>, vector<1x128xf32>
    %104 = vector.broadcast %103 : vector<1x128xf32> to vector<8x128xf32>
    %105 = arith.mulf %102, %104 : vector<8x128xf32>
    %c40_58 = arith.constant 40 : index
    %c0_59 = arith.constant 0 : index
    %106 = vector.load %arg11[%c40_58, %c0_59] : memref<73x128xf32, #tpu.memory_space<vmem>>, vector<8x128xf32>
    tpu.vector_store %arg11[%c40_58, %c0_59], %105 {strides = array<i32>} : memref<73x128xf32, #tpu.memory_space<vmem>>, vector<8x128xf32>,
    %cst_60 = arith.constant 0.000000e+00 : f32
    %107 = vector.broadcast %cst_60 : f32 to vector<8x21xf32>
    %108 = vector.extract_strided_slice %67 {offsets = [0, 21], sizes = [8, 107], strides = [1, 1]} : vector<8x128xf32> to vector<8x107xf32>
    %109 = tpu.concatenate %108, %107 in 1 : vector<8x107xf32>, vector<8x21xf32> -> vector<8x128xf32>
    %c15 = arith.constant 15 : index
    %c0_61 = arith.constant 0 : index
    %110 = vector.load %arg9[%c15, %c0_61] : memref<27x128xf32, #tpu.memory_space<vmem>>, vector<1x128xf32>
    %111 = vector.broadcast %110 : vector<1x128xf32> to vector<8x128xf32>
    %112 = arith.mulf %109, %111 : vector<8x128xf32>
    %c48_62 = arith.constant 48 : index
    %c0_63 = arith.constant 0 : index
    %113 = vector.load %arg11[%c48_62, %c0_63] : memref<73x128xf32, #tpu.memory_space<vmem>>, vector<8x128xf32>
    tpu.vector_store %arg11[%c48_62, %c0_63], %112 {strides = array<i32>} : memref<73x128xf32, #tpu.memory_space<vmem>>, vector<8x128xf32>,
    %cst_64 = arith.constant 0.000000e+00 : f32
    %114 = vector.broadcast %cst_64 : f32 to vector<8x24xf32>
    %115 = vector.extract_strided_slice %67 {offsets = [0, 24], sizes = [8, 104], strides = [1, 1]} : vector<8x128xf32> to vector<8x104xf32>
    %116 = tpu.concatenate %115, %114 in 1 : vector<8x104xf32>, vector<8x24xf32> -> vector<8x128xf32>
    %c16_65 = arith.constant 16 : index
    %c0_66 = arith.constant 0 : index
    %117 = vector.load %arg9[%c16_65, %c0_66] : memref<27x128xf32, #tpu.memory_space<vmem>>, vector<1x128xf32>
    %118 = vector.broadcast %117 : vector<1x128xf32> to vector<8x128xf32>
    %119 = arith.mulf %116, %118 : vector<8x128xf32>
    %c56_67 = arith.constant 56 : index
    %c0_68 = arith.constant 0 : index
    %120 = vector.load %arg11[%c56_67, %c0_68] : memref<73x128xf32, #tpu.memory_space<vmem>>, vector<8x128xf32>
    tpu.vector_store %arg11[%c56_67, %c0_68], %119 {strides = array<i32>} : memref<73x128xf32, #tpu.memory_space<vmem>>, vector<8x128xf32>,
    %cst_69 = arith.constant 0.000000e+00 : f32
    %121 = vector.broadcast %cst_69 : f32 to vector<8x27xf32>
    %122 = vector.extract_strided_slice %67 {offsets = [0, 27], sizes = [8, 101], strides = [1, 1]} : vector<8x128xf32> to vector<8x101xf32>
    %123 = tpu.concatenate %122, %121 in 1 : vector<8x101xf32>, vector<8x27xf32> -> vector<8x128xf32>
    %c17 = arith.constant 17 : index
    %c0_70 = arith.constant 0 : index
    %124 = vector.load %arg9[%c17, %c0_70] : memref<27x128xf32, #tpu.memory_space<vmem>>, vector<1x128xf32>
    %125 = vector.broadcast %124 : vector<1x128xf32> to vector<8x128xf32>
    %126 = arith.mulf %123, %125 : vector<8x128xf32>
    %c64_71 = arith.constant 64 : index
    %c0_72 = arith.constant 0 : index
    %127 = vector.load %arg11[%c64_71, %c0_72] : memref<73x128xf32, #tpu.memory_space<vmem>>, vector<8x128xf32>
    tpu.vector_store %arg11[%c64_71, %c0_72], %126 {strides = array<i32>} : memref<73x128xf32, #tpu.memory_space<vmem>>, vector<8x128xf32>,
    %c0_73 = arith.constant 0 : index
    %c0_74 = arith.constant 0 : index
    %128 = vector.load %arg4[%c0_73, %c0_74] : memref<8x73xf32, #tpu.memory_space<vmem>>, vector<8x73xf32>
    %c0_75 = arith.constant 0 : index
    %c0_76 = arith.constant 0 : index
    %129 = vector.load %arg11[%c0_75, %c0_76] : memref<73x128xf32, #tpu.memory_space<vmem>>, vector<73x128xf32>
    %cst_77 = arith.constant dense<0.000000e+00> : vector<8x128xf32>
    %130 = tpu.matmul %128, %129, %cst_77 {dimension_numbers = #tpu.dot_dimension_numbers<[1], [0], [0], [1], [0, 0, 1, 1], [], []>} : vector<8x73xf32>, vector<73x128xf32>, vector<8x128xf32> -> vector<8x128xf32>
    %cst_78 = arith.constant 0.000000e+00 : f32
    %131 = vector.broadcast %cst_78 : f32 to vector<8x128xf32>
    %132 = arith.maximumf %130, %131 : vector<8x128xf32>
    %cst_79 = arith.constant 0.000000e+00 : f32
    %133 = vector.broadcast %cst_79 : f32 to vector<8x45xf32>
    %134 = vector.extract_strided_slice %132 {offsets = [0, 0], sizes = [8, 83], strides = [1, 1]} : vector<8x128xf32> to vector<8x83xf32>
    %135 = tpu.concatenate %133, %134 in 1 : vector<8x45xf32>, vector<8x83xf32> -> vector<8x128xf32>
    %c18 = arith.constant 18 : index
    %c0_80 = arith.constant 0 : index
    %136 = vector.load %arg9[%c18, %c0_80] : memref<27x128xf32, #tpu.memory_space<vmem>>, vector<1x128xf32>
    %137 = vector.broadcast %136 : vector<1x128xf32> to vector<8x128xf32>
    %138 = arith.mulf %135, %137 : vector<8x128xf32>
    %c0_81 = arith.constant 0 : index
    %c0_82 = arith.constant 0 : index
    %139 = vector.load %arg11[%c0_81, %c0_82] : memref<73x128xf32, #tpu.memory_space<vmem>>, vector<8x128xf32>
    tpu.vector_store %arg11[%c0_81, %c0_82], %138 {strides = array<i32>} : memref<73x128xf32, #tpu.memory_space<vmem>>, vector<8x128xf32>,
    %cst_83 = arith.constant 0.000000e+00 : f32
    %140 = vector.broadcast %cst_83 : f32 to vector<8x40xf32>
    %141 = vector.extract_strided_slice %132 {offsets = [0, 0], sizes = [8, 88], strides = [1, 1]} : vector<8x128xf32> to vector<8x88xf32>
    %142 = tpu.concatenate %140, %141 in 1 : vector<8x40xf32>, vector<8x88xf32> -> vector<8x128xf32>
    %c19 = arith.constant 19 : index
    %c0_84 = arith.constant 0 : index
    %143 = vector.load %arg9[%c19, %c0_84] : memref<27x128xf32, #tpu.memory_space<vmem>>, vector<1x128xf32>
    %144 = vector.broadcast %143 : vector<1x128xf32> to vector<8x128xf32>
    %145 = arith.mulf %142, %144 : vector<8x128xf32>
    %c8_85 = arith.constant 8 : index
    %c0_86 = arith.constant 0 : index
    %146 = vector.load %arg11[%c8_85, %c0_86] : memref<73x128xf32, #tpu.memory_space<vmem>>, vector<8x128xf32>
    tpu.vector_store %arg11[%c8_85, %c0_86], %145 {strides = array<i32>} : memref<73x128xf32, #tpu.memory_space<vmem>>, vector<8x128xf32>,
    %cst_87 = arith.constant 0.000000e+00 : f32
    %147 = vector.broadcast %cst_87 : f32 to vector<8x35xf32>
    %148 = vector.extract_strided_slice %132 {offsets = [0, 0], sizes = [8, 93], strides = [1, 1]} : vector<8x128xf32> to vector<8x93xf32>
    %149 = tpu.concatenate %147, %148 in 1 : vector<8x35xf32>, vector<8x93xf32> -> vector<8x128xf32>
    %c20 = arith.constant 20 : index
    %c0_88 = arith.constant 0 : index
    %150 = vector.load %arg9[%c20, %c0_88] : memref<27x128xf32, #tpu.memory_space<vmem>>, vector<1x128xf32>
    %151 = vector.broadcast %150 : vector<1x128xf32> to vector<8x128xf32>
    %152 = arith.mulf %149, %151 : vector<8x128xf32>
    %c16_89 = arith.constant 16 : index
    %c0_90 = arith.constant 0 : index
    %153 = vector.load %arg11[%c16_89, %c0_90] : memref<73x128xf32, #tpu.memory_space<vmem>>, vector<8x128xf32>
    tpu.vector_store %arg11[%c16_89, %c0_90], %152 {strides = array<i32>} : memref<73x128xf32, #tpu.memory_space<vmem>>, vector<8x128xf32>,
    %cst_91 = arith.constant 0.000000e+00 : f32
    %154 = vector.broadcast %cst_91 : f32 to vector<8x5xf32>
    %155 = vector.extract_strided_slice %132 {offsets = [0, 0], sizes = [8, 123], strides = [1, 1]} : vector<8x128xf32> to vector<8x123xf32>
    %156 = tpu.concatenate %154, %155 in 1 : vector<8x5xf32>, vector<8x123xf32> -> vector<8x128xf32>
    %c21 = arith.constant 21 : index
    %c0_92 = arith.constant 0 : index
    %157 = vector.load %arg9[%c21, %c0_92] : memref<27x128xf32, #tpu.memory_space<vmem>>, vector<1x128xf32>
    %158 = vector.broadcast %157 : vector<1x128xf32> to vector<8x128xf32>
    %159 = arith.mulf %156, %158 : vector<8x128xf32>
    %c24_93 = arith.constant 24 : index
    %c0_94 = arith.constant 0 : index
    %160 = vector.load %arg11[%c24_93, %c0_94] : memref<73x128xf32, #tpu.memory_space<vmem>>, vector<8x128xf32>
    tpu.vector_store %arg11[%c24_93, %c0_94], %159 {strides = array<i32>} : memref<73x128xf32, #tpu.memory_space<vmem>>, vector<8x128xf32>,
    %c22 = arith.constant 22 : index
    %c0_95 = arith.constant 0 : index
    %161 = vector.load %arg9[%c22, %c0_95] : memref<27x128xf32, #tpu.memory_space<vmem>>, vector<1x128xf32>
    %162 = vector.broadcast %161 : vector<1x128xf32> to vector<8x128xf32>
    %163 = arith.mulf %132, %162 : vector<8x128xf32>
    %c32_96 = arith.constant 32 : index
    %c0_97 = arith.constant 0 : index
    %164 = vector.load %arg11[%c32_96, %c0_97] : memref<73x128xf32, #tpu.memory_space<vmem>>, vector<8x128xf32>
    tpu.vector_store %arg11[%c32_96, %c0_97], %163 {strides = array<i32>} : memref<73x128xf32, #tpu.memory_space<vmem>>, vector<8x128xf32>,
    %cst_98 = arith.constant 0.000000e+00 : f32
    %165 = vector.broadcast %cst_98 : f32 to vector<8x5xf32>
    %166 = vector.extract_strided_slice %132 {offsets = [0, 5], sizes = [8, 123], strides = [1, 1]} : vector<8x128xf32> to vector<8x123xf32>
    %167 = tpu.concatenate %166, %165 in 1 : vector<8x123xf32>, vector<8x5xf32> -> vector<8x128xf32>
    %c23 = arith.constant 23 : index
    %c0_99 = arith.constant 0 : index
    %168 = vector.load %arg9[%c23, %c0_99] : memref<27x128xf32, #tpu.memory_space<vmem>>, vector<1x128xf32>
    %169 = vector.broadcast %168 : vector<1x128xf32> to vector<8x128xf32>
    %170 = arith.mulf %167, %169 : vector<8x128xf32>
    %c40_100 = arith.constant 40 : index
    %c0_101 = arith.constant 0 : index
    %171 = vector.load %arg11[%c40_100, %c0_101] : memref<73x128xf32, #tpu.memory_space<vmem>>, vector<8x128xf32>
    tpu.vector_store %arg11[%c40_100, %c0_101], %170 {strides = array<i32>} : memref<73x128xf32, #tpu.memory_space<vmem>>, vector<8x128xf32>,
    %cst_102 = arith.constant 0.000000e+00 : f32
    %172 = vector.broadcast %cst_102 : f32 to vector<8x35xf32>
    %173 = vector.extract_strided_slice %132 {offsets = [0, 35], sizes = [8, 93], strides = [1, 1]} : vector<8x128xf32> to vector<8x93xf32>
    %174 = tpu.concatenate %173, %172 in 1 : vector<8x93xf32>, vector<8x35xf32> -> vector<8x128xf32>
    %c24_103 = arith.constant 24 : index
    %c0_104 = arith.constant 0 : index
    %175 = vector.load %arg9[%c24_103, %c0_104] : memref<27x128xf32, #tpu.memory_space<vmem>>, vector<1x128xf32>
    %176 = vector.broadcast %175 : vector<1x128xf32> to vector<8x128xf32>
    %177 = arith.mulf %174, %176 : vector<8x128xf32>
    %c48_105 = arith.constant 48 : index
    %c0_106 = arith.constant 0 : index
    %178 = vector.load %arg11[%c48_105, %c0_106] : memref<73x128xf32, #tpu.memory_space<vmem>>, vector<8x128xf32>
    tpu.vector_store %arg11[%c48_105, %c0_106], %177 {strides = array<i32>} : memref<73x128xf32, #tpu.memory_space<vmem>>, vector<8x128xf32>,
    %cst_107 = arith.constant 0.000000e+00 : f32
    %179 = vector.broadcast %cst_107 : f32 to vector<8x40xf32>
    %180 = vector.extract_strided_slice %132 {offsets = [0, 40], sizes = [8, 88], strides = [1, 1]} : vector<8x128xf32> to vector<8x88xf32>
    %181 = tpu.concatenate %180, %179 in 1 : vector<8x88xf32>, vector<8x40xf32> -> vector<8x128xf32>
    %c25 = arith.constant 25 : index
    %c0_108 = arith.constant 0 : index
    %182 = vector.load %arg9[%c25, %c0_108] : memref<27x128xf32, #tpu.memory_space<vmem>>, vector<1x128xf32>
    %183 = vector.broadcast %182 : vector<1x128xf32> to vector<8x128xf32>
    %184 = arith.mulf %181, %183 : vector<8x128xf32>
    %c56_109 = arith.constant 56 : index
    %c0_110 = arith.constant 0 : index
    %185 = vector.load %arg11[%c56_109, %c0_110] : memref<73x128xf32, #tpu.memory_space<vmem>>, vector<8x128xf32>
    tpu.vector_store %arg11[%c56_109, %c0_110], %184 {strides = array<i32>} : memref<73x128xf32, #tpu.memory_space<vmem>>, vector<8x128xf32>,
    %cst_111 = arith.constant 0.000000e+00 : f32
    %186 = vector.broadcast %cst_111 : f32 to vector<8x45xf32>
    %187 = vector.extract_strided_slice %132 {offsets = [0, 45], sizes = [8, 83], strides = [1, 1]} : vector<8x128xf32> to vector<8x83xf32>
    %188 = tpu.concatenate %187, %186 in 1 : vector<8x83xf32>, vector<8x45xf32> -> vector<8x128xf32>
    %c26 = arith.constant 26 : index
    %c0_112 = arith.constant 0 : index
    %189 = vector.load %arg9[%c26, %c0_112] : memref<27x128xf32, #tpu.memory_space<vmem>>, vector<1x128xf32>
    %190 = vector.broadcast %189 : vector<1x128xf32> to vector<8x128xf32>
    %191 = arith.mulf %188, %190 : vector<8x128xf32>
    %c64_113 = arith.constant 64 : index
    %c0_114 = arith.constant 0 : index
    %192 = vector.load %arg11[%c64_113, %c0_114] : memref<73x128xf32, #tpu.memory_space<vmem>>, vector<8x128xf32>
    tpu.vector_store %arg11[%c64_113, %c0_114], %191 {strides = array<i32>} : memref<73x128xf32, #tpu.memory_space<vmem>>, vector<8x128xf32>,
    %c0_115 = arith.constant 0 : index
    %c0_116 = arith.constant 0 : index
    %193 = vector.load %arg5[%c0_115, %c0_116] : memref<8x73xf32, #tpu.memory_space<vmem>>, vector<8x73xf32>
    %c0_117 = arith.constant 0 : index
    %c0_118 = arith.constant 0 : index
    %194 = vector.load %arg11[%c0_117, %c0_118] : memref<73x128xf32, #tpu.memory_space<vmem>>, vector<73x128xf32>
    %cst_119 = arith.constant dense<0.000000e+00> : vector<8x128xf32>
    %195 = tpu.matmul %193, %194, %cst_119 {dimension_numbers = #tpu.dot_dimension_numbers<[1], [0], [0], [1], [0, 0, 1, 1], [], []>} : vector<8x73xf32>, vector<73x128xf32>, vector<8x128xf32> -> vector<8x128xf32>
    %cst_120 = arith.constant 0.000000e+00 : f32
    %196 = vector.broadcast %cst_120 : f32 to vector<8x128xf32>
    %197 = arith.maximumf %195, %196 : vector<8x128xf32>
    %198 = arith.addf %2, %67 : vector<8x128xf32>
    %199 = arith.addf %198, %132 : vector<8x128xf32>
    %200 = arith.addf %199, %197 : vector<8x128xf32>
    %c0_121 = arith.constant 0 : index
    %c0_122 = arith.constant 0 : index
    %201 = vector.load %arg6[%c0_121, %c0_122] : memref<4x8xf32, #tpu.memory_space<vmem>>, vector<4x8xf32>
    %cst_123 = arith.constant dense<0.000000e+00> : vector<4x128xf32>
    %202 = tpu.matmul %201, %200, %cst_123 {dimension_numbers = #tpu.dot_dimension_numbers<[1], [0], [0], [1], [0, 0, 1, 1], [], []>} : vector<4x8xf32>, vector<8x128xf32>, vector<4x128xf32> -> vector<4x128xf32>
    %203 = vector.extract_strided_slice %202 {offsets = [0, 0], sizes = [4, 64], strides = [1, 1]} : vector<4x128xf32> to vector<4x64xf32>
    %204 = vector.extract_strided_slice %202 {offsets = [0, 64], sizes = [4, 64], strides = [1, 1]} : vector<4x128xf32> to vector<4x64xf32>
    %205 = tpu.concatenate %203, %204 in 0 : vector<4x64xf32>, vector<4x64xf32> -> vector<8x64xf32>
    %c0_124 = arith.constant 0 : index
    %c0_125 = arith.constant 0 : index
    %206 = vector.load %arg8[%c0_124, %c0_125] : memref<64x256xf32, #tpu.memory_space<vmem>>, vector<64x256xf32>
    %cst_126 = arith.constant dense<0.000000e+00> : vector<8x256xf32>
    %207 = tpu.matmul %205, %206, %cst_126 {dimension_numbers = #tpu.dot_dimension_numbers<[1], [0], [0], [1], [0, 0, 1, 1], [], []>} : vector<8x64xf32>, vector<64x256xf32>, vector<8x256xf32> -> vector<8x256xf32>
    %c0_127 = arith.constant 0 : index
    %c0_128 = arith.constant 0 : index
    %208 = vector.load %arg7[%c0_127, %c0_128] : memref<8x1xf32, #tpu.memory_space<vmem>>, vector<8x1xf32>
    %209 = vector.broadcast %208 : vector<8x1xf32> to vector<8x256xf32>
    %210 = arith.addf %207, %209 : vector<8x256xf32>
    %cst_129 = arith.constant 0.000000e+00 : f32
    %211 = vector.broadcast %cst_129 : f32 to vector<8x256xf32>
    %212 = arith.maximumf %210, %211 : vector<8x256xf32>
    %c0_130 = arith.constant 0 : index
    %c0_131 = arith.constant 0 : index
    %213 = vector.load %arg1[%c0_130, %c0_131] : memref<8x256xf32, #tpu.memory_space<vmem>>, vector<8x256xf32>
    %214 = arith.addf %213, %212 : vector<8x256xf32>
    %c0_132 = arith.constant 0 : index
    %c0_133 = arith.constant 0 : index
    %215 = vector.load %arg10[%c0_132, %c0_133] : memref<8x256xf32, #tpu.memory_space<vmem>>, vector<8x256xf32>
    tpu.vector_store %arg10[%c0_132, %c0_133], %214 {strides = array<i32>} : memref<8x256xf32, #tpu.memory_space<vmem>>, vector<8x256xf32>,
    return
  }
  func.func @transform_0(%arg0: i32) -> (i32, i32) {
    %c0_i32 = arith.constant 0 : i32
    %c0_i32_0 = arith.constant 0 : i32
    return %arg0, %c0_i32 : i32, i32
  }
  func.func @transform_1(%arg0: i32) -> (i32, i32) {
    %c0_i32 = arith.constant 0 : i32
    %c0_i32_0 = arith.constant 0 : i32
    return %c0_i32, %arg0 : i32, i32
  }
  func.func @transform_2(%arg0: i32) -> (i32, i32) {
    %c0_i32 = arith.constant 0 : i32
    %c0_i32_0 = arith.constant 0 : i32
    %c0_i32_1 = arith.constant 0 : i32
    return %c0_i32, %c0_i32_0 : i32, i32
  }
  func.func @transform_3(%arg0: i32) -> (i32, i32) {
    %c0_i32 = arith.constant 0 : i32
    %c0_i32_0 = arith.constant 0 : i32
    %c0_i32_1 = arith.constant 0 : i32
    return %c0_i32, %c0_i32_0 : i32, i32
  }
  func.func @transform_4(%arg0: i32) -> (i32, i32) {
    %c0_i32 = arith.constant 0 : i32
    %c0_i32_0 = arith.constant 0 : i32
    %c0_i32_1 = arith.constant 0 : i32
    return %c0_i32, %c0_i32_0 : i32, i32
  }
  func.func @transform_5(%arg0: i32) -> (i32, i32) {
    %c0_i32 = arith.constant 0 : i32
    %c0_i32_0 = arith.constant 0 : i32
    %c0_i32_1 = arith.constant 0 : i32
    return %c0_i32, %c0_i32_0 : i32, i32
  }
  func.func @transform_6(%arg0: i32) -> (i32, i32) {
    %c0_i32 = arith.constant 0 : i32
    %c0_i32_0 = arith.constant 0 : i32
    %c0_i32_1 = arith.constant 0 : i32
    return %c0_i32, %c0_i32_0 : i32, i32
  }
  func.func @transform_7(%arg0: i32) -> (i32, i32) {
    %c0_i32 = arith.constant 0 : i32
    %c0_i32_0 = arith.constant 0 : i32
    %c0_i32_1 = arith.constant 0 : i32
    return %c0_i32, %c0_i32_0 : i32, i32
  }
  func.func @transform_8(%arg0: i32) -> (i32, i32) {
    %c0_i32 = arith.constant 0 : i32
    %c0_i32_0 = arith.constant 0 : i32
    %c0_i32_1 = arith.constant 0 : i32
    return %c0_i32, %c0_i32_0 : i32, i32
  }
  func.func @transform_9(%arg0: i32) -> (i32, i32) {
    %c0_i32 = arith.constant 0 : i32
    %c0_i32_0 = arith.constant 0 : i32
    return %arg0, %c0_i32 : i32, i32
  }
}

</mosaic_0001>

<bundles_post_ra>
// kernel: tpu_custom_call.1
= control target key start
LH: loop header
LB: loop body
LE: loop exit
PB: predicated region body
PF: predicated region fallthrough
CT: control target
= control target key end

     0   :  { %14 = vsyncpa [#allocation4], 0  ;;  %s1040_s0 = inlined_call_operand.hbm [shape: f32[8,256], index: 0, kind: input, shape index: {}]   ;;  %s1041_s1 = inlined_call_operand.vmem [shape: f32[8,128], index: 1, kind: input, shape index: {}]   ;;  %s1042_s2 = inlined_call_operand.hbm [shape: f32[8,73], index: 2, kind: input, shape index: {}]   ;;  %s1043_s3 = inlined_call_operand.hbm [shape: f32[8,73], index: 3, kind: input, shape index: {}]   ;;  %s1044_s4 = inlined_call_operand.hbm [shape: f32[8,73], index: 4, kind: input, shape index: {}]   ;;  %s1045_s5 = inlined_call_operand.hbm [shape: f32[4,8], index: 5, kind: input, shape index: {}]   ;;  %s1046_s6 = inlined_call_operand.vmem [shape: f32[8,1], index: 6, kind: input, shape index: {}]   ;;  %s1047_s7 = inlined_call_operand.hbm [shape: f32[64,256], index: 7, kind: input, shape index: {}]   ;;  %s1048_s8 = inlined_call_operand.hbm [shape: f32[27,128], index: 8, kind: input, shape index: {}]   ;;  %s1049_s9 = inlined_call_operand.hbm [shape: f32[8,256], index: 9, kind: output, shape index: {}]  }
   0x1   :  { %15 = vsyncpa [#allocation7], 0 }
   0x2   :  { %16 = vsyncpa [#allocation10], 0 }
   0x3   :  { %17 = vsyncpa [#allocation13], 0  ;;  %s37_s11 = sshll.u32 %s1042_s2, 4  ;;  %s38_s11 = int_to_ptr.hbm [resolvable:$true] %s37_s11 }
   0x4   :  { %18 = vsyncpa [#allocation5], 0  ;;  %s887_s12 = smov [#allocation6]   ;;  %s59_s16 = sshll.u32 %s1044_s4, 4  ;;  %s60_s16 = int_to_ptr.hbm [resolvable:$true] %s59_s16 }
   0x5   :  { %s39_s13 = sshll.u32 %s887_s12, 4  ;;  %s888_s17 = smov [#allocation9]   ;;  %s40_s13 = int_to_ptr.vmem [resolvable:$true] %s39_s13 }
   0x6   :  { %42 = dma.hbm_to_vmem [thread:$0]  %s38_s11, 128, %s40_s13, [#allocation7]  }
   0x7   :  { %s61_s18 = sshll.u32 %s888_s17, 4  ;;  %s82_s21 = sshll.u32 %s1047_s7, 4  ;;  %s62_s18 = int_to_ptr.vmem [resolvable:$true] %s61_s18  ;;  %s83_s21 = int_to_ptr.hbm [resolvable:$true] %s82_s21 }
   0x8   :  { %64 = dma.hbm_to_vmem [thread:$0]  %s60_s16, 128, %s62_s18, [#allocation10]  }
   0x9   :  { %s889_s2 = smov [#allocation12]   ;;  %s24_s25 = sshll.u32 %s1040_s0, 4  ;;  %s25_s25 = int_to_ptr.hbm [resolvable:$true] %s24_s25 }
   0xa   :  { %s84_s22 = sshll.u32 %s889_s2, 4  ;;  %s890_s26 = smov 256   ;;  %s85_s22 = int_to_ptr.vmem [resolvable:$true] %s84_s22 }
   0xb   :  { %s891_s4 = smov 16   ;;  %s892_s27 = smov [#allocation3]  }
   0xc   :  { %90 = dma.hbm_to_vmem [thread:$0]  %s83_s21, 2048, %s85_s22, [#allocation13], %s890_s26, %s890_s26, %s891_s4  }
   0xd   :  { %s26_s28 = sshll.u32 %s892_s27, 4  ;;  %s48_s7 = sshll.u32 %s1043_s3, 4  ;;  %s27_s28 = int_to_ptr.vmem [resolvable:$true] %s26_s28  ;;  %s49_s7 = int_to_ptr.hbm [resolvable:$true] %s48_s7 }
   0xe   :  { %29 = dma.hbm_to_vmem [thread:$0]  %s25_s25, 256, %s27_s28, [#allocation4]  }
   0xf   :  { %s70_s12 = sshll.u32 %s1045_s5, 4  ;;  %s893_s13 = smov [#allocation8]   ;;  %s71_s12 = int_to_ptr.hbm [resolvable:$true] %s70_s12 }
  0x10   :  { %s50_s14 = sshll.u32 %s893_s13, 4  ;;  %s894_s0 = smov [#allocation11]   ;;  %s51_s14 = int_to_ptr.vmem [resolvable:$true] %s50_s14 }
  0x11   :  { %53 = dma.hbm_to_vmem [thread:$0]  %s49_s7, 128, %s51_s14, [#allocation7]  }
  0x12   :  { %s72_s15 = sshll.u32 %s894_s0, 4  ;;  %s95_s18 = sshll.u32 %s1048_s8, 4  ;;  %s73_s15 = int_to_ptr.vmem [resolvable:$true] %s72_s15  ;;  %s96_s18 = int_to_ptr.hbm [resolvable:$true] %s95_s18 }
  0x13   :  { %75 = dma.hbm_to_vmem [thread:$0]  %s71_s12, 64, %s73_s15, [#allocation10]  }
  0x14   :  { %s895_s3 = smov [#allocation14]   ;;  %s896_s20 = smov 128  }
  0x15   :  { %s97_s19 = sshll.u32 %s895_s3, 4  ;;  %s897_s21 = smov 8   ;;  %s98_s19 = int_to_ptr.vmem [resolvable:$true] %s97_s19 }
  0x16   :  { %103 = dma.hbm_to_vmem [thread:$0]  %s96_s18, 512, %s98_s19, [#allocation13], %s896_s20, %s896_s20, %s897_s21  }
  0x17   :  { %877 = dma.done.wait [#allocation4], 256  }
  0x18   :  { %878 = vsyncadd [#allocation4], 4294967040 }
  0x19   :  { %879 = dma.done.wait [#allocation7], 256  }
  0x1a   :  { %880 = vsyncadd [#allocation7], 4294967040 }
  0x1b   :  { %881 = dma.done.wait [#allocation10], 192  }
  0x1c   :  { %882 = vsyncadd [#allocation10], 4294967104 }
  0x1d   :  { %883 = dma.done.wait [#allocation13], 2560  }
  0x1e   :  { %884 = vsyncadd [#allocation13], 4294964736  ;;  %v999_v0 = vld [vmem:[%s1041_s1] sm:$0xff]  ;;  %s898_s8 = smov 119   ;;  %s899_s22 = smov 121   ;;  %v905_v1 = vmov 1.0  }
  0x1f   :  { %202 = vrot.lane.b32.xlu0 %v999_v0, %s898_s8  ;;  %184 = vrot.lane.b32.xlu1 %v999_v0, %s899_s22  ;;  %s900_s23 = smov 1   ;;  %s901_s24 = smov 120   ;;  %132 = vst [vmem:[#allocation2 + $0x28] sm:$0x1] %v905_v1  ;;  %vm226_vm0 = vcmask 1040384   ;;  %vm205_vm1 = vcmask 973824  }
  0x20   :  { %162 = vrot.lane.b32.xlu2 %v999_v0, %s900_s23  ;;  %s902_s25 = smov 127   ;;  %s903_s26 = smov 7   ;;  %v658_v3 = vld [vmem:[#allocation14 + $0x8] ss:$0 sm:$0xff]  ;;  %vm187_vm2 = vcmask 990208   ;;  %vm196_vm3 = vcmask 982016  }
  0x21   :  { %s904_s1 = smov 9   ;;  %v660_v9 = vld [vmem:[#allocation14 + $0x7] ss:$0 sm:$0xff]  ;;  %vm178_vm4 = vcmask 1039360   ;;  %v659_v10 = vld [vmem:[#allocation14 + $0x6] ss:$0 sm:$0xff] }
  0x22   :  { %v662_v12 = vld [vmem:[#allocation14 + $0x5] ss:$0 sm:$0xff]  ;;  %v666_v18 = vld [vmem:[#allocation14 + $0x4] ss:$0 sm:$0xff]  ;;  %vm165_vm5 = vcmask 7168   ;;  %vm156_vm6 = vcmask 56320  }
  0x23   :  { %v661_v22 = vld [vmem:[#allocation14 + $0x3] ss:$0 sm:$0xff]  ;;  %v663_v23 = vld [vmem:[#allocation14 + $0x2] ss:$0 sm:$0xff]  ;;  %vm147_vm7 = vcmask 64512   ;;  %v173_v24 = vmul.f32 %v666_v18, %v999_v0  ;;  %vm138_vm8 = vcmask 72704  }
  0x24   :  { %v664_v27 = vld [vmem:[#allocation14 + $0x1] ss:$0 sm:$0xff]  ;;  %v665_v33 = vld [vmem:[#allocation14] ss:$0 sm:$0xff]  ;;  %v211_v37 = vld [vmem:[#allocation6] sm:$0xff]  ;;  %vm222_vm9 = vcmask 596992  }
  0x25   :  { %s906_s4 = smov 107   ;;  %s907_s27 = smov 104   ;;  %vm322_vm10 = vcmask 826368   ;;  %v667_v41 = vld [vmem:[#allocation14 + $0x11] ss:$0 sm:$0xff]  ;;  %vm304_vm11 = vcmask 875520  }
  0x26   :  { %v221_v2 = vld [vmem:[#allocation2 + $0x28] sm:$0x1]  ;;  %s908_s28 = smov 101   ;;  %s909_s29 = smov 21   ;;  %vm313_vm12 = vcmask 850944   ;;  %vm295_vm13 = vcmask 1022976  }
  0x27   :  { %193 = vrot.lane.b32.xlu0 %v999_v0, %s901_s24  ;;  %175 = vrot.lane.b32.xlu1 %v999_v0, %s902_s25  ;;  %s910_s30 = smov 3   ;;  %s911_s7 = smov 125   ;;  %v338_v40 = vld [vmem:[#allocation2 + $0x28] sm:$0x1]  ;;  %v671_v46 = vld [vmem:[#allocation14 + $0x10] ss:$0 sm:$0xff] }
  0x28   :  { %153 = vrot.lane.b32.xlu2 %v999_v0, %s903_s26  ;;  %609 = vmatpush.msk.msra.mxu0 %vm226_vm0, %v221_v2  ;;  %s912_s10 = smov 27   ;;  %s913_s11 = smov 24   ;;  %v670_v47 = vld [vmem:[#allocation14 + $0xf] ss:$0 sm:$0xff]  ;;  %v668_v52 = vld [vmem:[#allocation14 + $0xe] ss:$0 sm:$0xff] }
  0x29   :  { %611 = vmatpush.msk.msra.mxu1 %vm226_vm0, %v338_v40  ;;  %v675_v56 = vld [vmem:[#allocation14 + $0xd] ss:$0 sm:$0xff]  ;;  %vm273_vm14 = vcmask 171008   ;;  %vm282_vm15 = vcmask 23552   ;;  %v673_v58 = vld [vmem:[#allocation14 + $0xc] ss:$0 sm:$0xff] }
  0x2a   :  { %v672_v60 = vld [vmem:[#allocation14 + $0xb] ss:$0 sm:$0xff]  ;;  %s914_s12 = smov 93   ;;  %s915_s13 = smov 88   ;;  %v682_v40 = vld [vmem:[#allocation14 + $0x17] ss:$0 sm:$0xff] }
  0x2b   :  { %s916_s14 = smov 83   ;;  %s917_s0 = smov 35  }
  0x2c   :  { %s918_s15 = smov 5   ;;  %s919_s16 = smov 123  }
  0x2d   :  { %s920_s17 = smov 45   ;;  %s921_s18 = smov 40  }
  0x2e   :  { %s922_s3 = smov 64   ;;  %s596_s8 = sshll.u32 %s1049_s9, 4  ;;  %s597_s8 = int_to_ptr.hbm [resolvable:$true] %s596_s8 }
  0x2f   :  { %144 = vrot.lane.b32.xlu0 %v999_v0, %s897_s21  ;;  %135 = vrot.lane.b32.xlu1 %v999_v0, %s904_s1 }
  0x7a   :  { %v163_v8 = vpop.permute.xlu2 %162 }
  0x7b   :  { %v166_v25 = vsel %vm165_vm5, 0.0, %v163_v8  ;;  %v674_v8 = vld [vmem:[#allocation14 + $0x9] ss:$0 sm:$0xff]  ;;  %vm370_vm5 = vcmask 367616  }
  0x7c   :  { %v169_v31 = vmul.f32 %v661_v22, %v166_v25 }
  0x82   :  { %v154_v21 = vpop.permute.xlu2 %153 }
  0x83   :  { %v157_v26 = vsel %vm156_vm6, 0.0, %v154_v21  ;;  %vm419_vm6 = vcmask 760832  }
  0x84   :  { %v160_v32 = vmul.f32 %v663_v23, %v157_v26  ;;  %v677_v23 = vld [vmem:[#allocation14 + $0x15] ss:$0 sm:$0xff] }
  0x91   :  { %v203_v4 = vpop.permute.xlu0 %202  ;;  %v185_v5 = vpop.permute.xlu1 %184 }
  0x92   :  { %v206_v6 = vsel %vm205_vm1, %v203_v4, 0.0  ;;  %v188_v14 = vsel %vm187_vm2, %v185_v5, 0.0  ;;  %vm264_vm1 = vcmask 195584   ;;  %vm255_vm2 = vcmask 220160  }
  0x93   :  { %v209_v7 = vmul.f32 %v658_v3, %v206_v6  ;;  %v191_v19 = vmul.f32 %v659_v10, %v188_v14  ;;  %v669_v3 = vld [vmem:[#allocation14 + $0xa] ss:$0 sm:$0xff] }
  0x95   :  { %237 = vmatpush.msra.mxu0 %v209_v7 }
  0x99   :  { %v194_v11 = vpop.permute.xlu0 %193  ;;  %v176_v13 = vpop.permute.xlu1 %175 }
  0x9a   :  { %v197_v15 = vsel %vm196_vm3, %v194_v11, 0.0  ;;  %v179_v16 = vsel %vm178_vm4, %v176_v13, 0.0  ;;  %v684_v13 = vld [vmem:[#allocation14 + $0x16] ss:$0 sm:$0xff]  ;;  %vm428_vm3 = vcmask 719872   ;;  %vm397_vm4 = vcmask 39936  }
  0x9b   :  { %v200_v17 = vmul.f32 %v660_v9, %v197_v15  ;;  %v182_v20 = vmul.f32 %v662_v12, %v179_v16  ;;  %v328_v12 = vld [vmem:[#allocation8] sm:$0xff] }
  0x9d   :  { %238 = vmatpush.msra.mxu0 %v200_v17 }
  0x9f   :  { %239 = vmatpush.msra.mxu0 %v191_v19  ;;  %v676_v19 = vld [vmem:[#allocation14 + $0x19] ss:$0 sm:$0xff] }
  0xa1   :  { %v145_v28 = vpop.permute.xlu0 %144  ;;  %v136_v29 = vpop.permute.xlu1 %135  ;;  %240 = vmatpush.msra.mxu0 %v182_v20 }
  0xa2   :  { %v148_v30 = vsel %vm147_vm7, 0.0, %v145_v28  ;;  %v139_v34 = vsel %vm138_vm8, 0.0, %v136_v29  ;;  %vm437_vm8 = vcmask 678912  }
  0xa3   :  { %241 = vmatpush.msra.mxu0 %v173_v24  ;;  %v151_v35 = vmul.f32 %v664_v27, %v148_v30  ;;  %v142_v36 = vmul.f32 %v665_v33, %v139_v34  ;;  %v678_v27 = vld [vmem:[#allocation14 + $0x12] ss:$0 sm:$0xff] }
  0xa5   :  { %242 = vmatpush.msra.mxu0 %v169_v31  ;;  %v679_v31 = vld [vmem:[#allocation14 + $0x18] ss:$0 sm:$0xff] }
  0xa7   :  { %243 = vmatpush.msra.mxu0 %v160_v32  ;;  %v680_v32 = vld [vmem:[#allocation14 + $0x1a] ss:$0 sm:$0xff] }
  0xa9   :  { %244 = vmatpush.msra.mxu0 %v151_v35 }
  0xab   :  { %245 = vmatpush.msra.mxu0 %v142_v36 }
  0xac   :  { %610 = vmatmul.msk.f32.vlgmr.msra.gmra.mxu0 %vm222_vm9, %v211_v37 }
 0x129   :  { %v247_v38 = vpop.f32.mrf.mxu0 }
 0x12a   :  { %v1013_v39 = vmax.f32 %v247_v38, 0.0 }
 0x12c   :  { %301 = vrot.lane.b32.xlu1 %v1013_v39, %s906_s4  ;;  %310 = vrot.lane.b32.xlu0 %v1013_v39, %s907_s27  ;;  %v290_v63 = vmul.f32 %v675_v56, %v1013_v39  ;;  %v481_v16 = vadd.f32 %v1013_v39, %v999_v0  ;;  %v453_v0 = vld [vmem:[#allocation2 + $0x28] sm:$0x1]  ;;  %v529_v56 = vld [vmem:[#allocation12 + $0x70] sm:$0xff] }
 0x12d   :  { %319 = vrot.lane.b32.xlu2 %v1013_v39, %s908_s28  ;;  %613 = vmatpush.msk.msra.mxu2 %vm226_vm0, %v453_v0  ;;  %vm388_vm0 = vcmask 285696  }
 0x12e   :  { %549 = vmatpush.msra.mxu3 %v529_v56 }
 0x134   :  { %270 = vrot.lane.b32.xlu1 %v1013_v39, %s909_s29  ;;  %279 = vrot.lane.b32.xlu0 %v1013_v39, %s910_s30 }
 0x135   :  { %292 = vrot.lane.b32.xlu2 %v1013_v39, %s911_s7 }
 0x13c   :  { %252 = vrot.lane.b32.xlu0 %v1013_v39, %s912_s10 }
 0x13d   :  { %261 = vrot.lane.b32.xlu2 %v1013_v39, %s913_s11  ;;  %v681_v39 = vld [vmem:[#allocation14 + $0x14] ss:$0 sm:$0xff] }
 0x187   :  { %v320_v42 = vpop.permute.xlu2 %319 }
 0x188   :  { %v323_v43 = vsel %vm322_vm10, %v320_v42, 0.0  ;;  %vm410_vm10 = vcmask 1006592  }
 0x189   :  { %v326_v44 = vmul.f32 %v667_v41, %v323_v43 }
 0x18b   :  { %352 = vmatpush.msra.mxu1 %v326_v44 }
 0x18f   :  { %v293_v45 = vpop.permute.xlu2 %292 }
 0x190   :  { %v296_v54 = vsel %vm295_vm13, %v293_v45, 0.0 }
 0x191   :  { %v299_v57 = vmul.f32 %v668_v52, %v296_v54 }
 0x197   :  { %v262_v59 = vpop.permute.xlu2 %261 }
 0x198   :  { %v265_v5 = vsel %vm264_vm1, 0.0, %v262_v59  ;;  %v523_v59 = vld [vmem:[#allocation12 + $0x40] sm:$0xff] }
 0x199   :  { %v268_v7 = vmul.f32 %v669_v3, %v265_v5  ;;  %v526_v3 = vld [vmem:[#allocation12 + $0x58] sm:$0xff] }
 0x19e   :  { %v302_v48 = vpop.permute.xlu1 %301  ;;  %v311_v49 = vpop.permute.xlu0 %310 }
 0x19f   :  { %v305_v50 = vsel %vm304_vm11, %v302_v48, 0.0  ;;  %v314_v51 = vsel %vm313_vm12, %v311_v49, 0.0  ;;  %vm379_vm11 = vcmask 326656  }
 0x1a0   :  { %v317_v53 = vmul.f32 %v671_v46, %v314_v51  ;;  %v308_v55 = vmul.f32 %v670_v47, %v305_v50  ;;  %v683_v47 = vld [vmem:[#allocation14 + $0x13] ss:$0 sm:$0xff]  ;;  %v443_v51 = vld [vmem:[#allocation9] sm:$0xff] }
 0x1a2   :  { %353 = vmatpush.msra.mxu1 %v317_v53 }
 0x1a4   :  { %354 = vmatpush.msra.mxu1 %v308_v55  ;;  %v484_v55 = vld [vmem:[#allocation11] sm:$0xf] }
 0x1a6   :  { %v271_v61 = vpop.permute.xlu1 %270  ;;  %v280_v62 = vpop.permute.xlu0 %279  ;;  %355 = vmatpush.msra.mxu1 %v299_v57  ;;  %v527_v57 = vld [vmem:[#allocation12 + $0x60] sm:$0xff] }
 0x1a7   :  { %v274_v1 = vsel %vm273_vm14, 0.0, %v271_v61  ;;  %v283_v2 = vsel %vm282_vm15, 0.0, %v280_v62  ;;  %550 = vmatpush.msra.mxu3 %v527_v57  ;;  %v519_v61 = vld [vmem:[#allocation12 + $0x20] sm:$0xff]  ;;  %v517_v62 = vld [vmem:[#allocation12 + $0x10] sm:$0xff] }
 0x1a8   :  { %v286_v4 = vmul.f32 %v673_v58, %v283_v2  ;;  %356 = vmatpush.msra.mxu1 %v290_v63  ;;  %v277_v6 = vmul.f32 %v672_v60, %v274_v1  ;;  %v525_v58 = vld [vmem:[#allocation12 + $0x50] sm:$0xff]  ;;  %v515_v63 = vld [vmem:[#allocation12] sm:$0xff]  ;;  %v530_v1 = vld [vmem:[#allocation12 + $0x78] sm:$0xff] }
 0x1a9   :  { %551 = vmatpush.msra.mxu3 %v525_v58  ;;  %v521_v60 = vld [vmem:[#allocation12 + $0x30] sm:$0xff]  ;;  %v528_v2 = vld [vmem:[#allocation12 + $0x68] sm:$0xff] }
 0x1aa   :  { %357 = vmatpush.msra.mxu1 %v286_v4 }
 0x1ab   :  { %552 = vmatpush.msra.mxu3 %v523_v59 }
 0x1ac   :  { %358 = vmatpush.msra.mxu1 %v277_v6  ;;  %v524_v6 = vld [vmem:[#allocation12 + $0x48] sm:$0xff] }
 0x1ad   :  { %553 = vmatpush.msra.mxu3 %v521_v60 }
 0x1ae   :  { %v253_v9 = vpop.permute.xlu0 %252  ;;  %359 = vmatpush.msra.mxu1 %v268_v7  ;;  %v522_v7 = vld [vmem:[#allocation12 + $0x38] sm:$0xff] }
 0x1af   :  { %v256_v10 = vsel %vm255_vm2, 0.0, %v253_v9  ;;  %554 = vmatpush.msra.mxu3 %v519_v61  ;;  %v518_v9 = vld [vmem:[#allocation12 + $0x18] sm:$0xff] }
 0x1b0   :  { %v259_v11 = vmul.f32 %v674_v8, %v256_v10  ;;  %v520_v8 = vld [vmem:[#allocation12 + $0x28] sm:$0xff] }
 0x1b1   :  { %555 = vmatpush.msra.mxu3 %v517_v62  ;;  %v516_v10 = vld [vmem:[#allocation12 + $0x8] sm:$0xff] }
 0x1b2   :  { %360 = vmatpush.msra.mxu1 %v259_v11  ;;  %v531_v11 = vld [vmem:[%s1046_s6] sm:$0xff]  ;;  %s924_s6 = smov [#allocation15]  }
 0x1b3   :  { %612 = vmatmul.msk.f32.vlgmr.msra.gmra.mxu1 %vm222_vm9, %v328_v12  ;;  %556 = vmatpush.msra.mxu3 %v515_v63  ;;  %v923_v12 = vmov 0   ;;  %s594_s21 = sshll.u32 %s924_s6, 4  ;;  %s595_s21 = int_to_ptr.vmem [resolvable:$true] %s594_s21 }
 0x1b4   :  { %656 = vset.pattern.permute.xlu1 %v923_v12  ;;  %657 = vset.pattern.permute.xlu0 %v923_v12 }
 0x1b5   :  { %569 = vmatpush.msrb.mxu3 %v530_v1 }
 0x1b7   :  { %570 = vmatpush.msrb.mxu3 %v528_v2 }
 0x1b9   :  { %571 = vmatpush.msrb.mxu3 %v526_v3 }
 0x1bb   :  { %572 = vmatpush.msrb.mxu3 %v524_v6 }
 0x1bd   :  { %573 = vmatpush.msrb.mxu3 %v522_v7 }
 0x1bf   :  { %574 = vmatpush.msrb.mxu3 %v520_v8 }
 0x1c1   :  { %575 = vmatpush.msrb.mxu3 %v518_v9 }
 0x1c3   :  { %576 = vmatpush.msrb.mxu3 %v516_v10 }
 0x230   :  { %v362_v14 = vpop.f32.mrf.mxu1 }
 0x231   :  { %v365_v15 = vmax.f32 %v362_v14, 0.0 }
 0x233   :  { %416 = vrot.lane.b32.xlu0 %v365_v15, %s914_s12  ;;  %425 = vrot.lane.b32.xlu2 %v365_v15, %s915_s13  ;;  %v405_v17 = vmul.f32 %v684_v13, %v365_v15  ;;  %v1028_v18 = vadd.f32 %v481_v16, %v365_v15 }
 0x234   :  { %434 = vrot.lane.b32.xlu1 %v365_v15, %s916_s14 }
 0x23b   :  { %385 = vrot.lane.b32.xlu0 %v365_v15, %s917_s0  ;;  %394 = vrot.lane.b32.xlu2 %v365_v15, %s918_s15 }
 0x23c   :  { %407 = vrot.lane.b32.xlu1 %v365_v15, %s919_s16 }
 0x243   :  { %367 = vrot.lane.b32.xlu2 %v365_v15, %s920_s17 }
 0x244   :  { %376 = vrot.lane.b32.xlu1 %v365_v15, %s921_s18 }
 0x24c   :  { %534 = vperm.xlu1 %656, %v531_v11  }
 0x28d   :  { %v426_v20 = vpop.permute.xlu2 %425 }
 0x28e   :  { %v429_v21 = vsel %vm428_vm3, %v426_v20, 0.0 }
 0x28f   :  { %v432_v22 = vmul.f32 %v676_v19, %v429_v21 }
 0x295   :  { %v395_v24 = vpop.permute.xlu2 %394 }
 0x296   :  { %v398_v25 = vsel %vm397_vm4, 0.0, %v395_v24 }
 0x297   :  { %v401_v26 = vmul.f32 %v677_v23, %v398_v25 }
 0x29d   :  { %v368_v28 = vpop.permute.xlu2 %367 }
 0x29e   :  { %v371_v29 = vsel %vm370_vm5, 0.0, %v368_v28 }
 0x29f   :  { %v374_v30 = vmul.f32 %v678_v27, %v371_v29 }
 0x2a5   :  { %v417_v33 = vpop.permute.xlu0 %416 }
 0x2a6   :  { %v420_v34 = vsel %vm419_vm6, %v417_v33, 0.0  ;;  %v435_v35 = vpop.permute.xlu1 %434 }
 0x2a7   :  { %v423_v36 = vmul.f32 %v679_v31, %v420_v34  ;;  %v438_v37 = vsel %vm437_vm8, %v435_v35, 0.0 }
 0x2a8   :  { %v441_v38 = vmul.f32 %v680_v32, %v438_v37 }
 0x2aa   :  { %467 = vmatpush.msra.mxu2 %v441_v38 }
 0x2ac   :  { %468 = vmatpush.msra.mxu2 %v432_v22  ;;  %v584_v22 = vld [vmem:[#allocation3 + $0x8] sm:$0xff] }
 0x2ad   :  { %v386_v41 = vpop.permute.xlu0 %385 }
 0x2ae   :  { %v389_v42 = vsel %vm388_vm0, 0.0, %v386_v41  ;;  %v408_v43 = vpop.permute.xlu1 %407  ;;  %469 = vmatpush.msra.mxu2 %v423_v36 }
 0x2af   :  { %v392_v44 = vmul.f32 %v681_v39, %v389_v42  ;;  %v411_v45 = vsel %vm410_vm10, %v408_v43, 0.0 }
 0x2b0   :  { %v414_v46 = vmul.f32 %v682_v40, %v411_v45 }
 0x2b2   :  { %470 = vmatpush.msra.mxu2 %v414_v46 }
 0x2b4   :  { %471 = vmatpush.msra.mxu2 %v405_v17 }
 0x2b6   :  { %v377_v48 = vpop.permute.xlu1 %376  ;;  %472 = vmatpush.msra.mxu2 %v401_v26 }
 0x2b7   :  { %v380_v49 = vsel %vm379_vm11, 0.0, %v377_v48 }
 0x2b8   :  { %v383_v50 = vmul.f32 %v683_v47, %v380_v49  ;;  %473 = vmatpush.msra.mxu2 %v392_v44 }
 0x2ba   :  { %474 = vmatpush.msra.mxu2 %v383_v50 }
 0x2bc   :  { %475 = vmatpush.msra.mxu2 %v374_v30 }
 0x2bd   :  { %614 = vmatmul.msk.f32.vlgmr.msra.gmra.mxu2 %vm222_vm9, %v443_v51  ;;  %vm537_vm9 = vcmask 523264  }
 0x2be   :  { %v535_v15 = vpop.permute.xlu1 %534 }
 0x340   :  { %v477_v52 = vpop.f32.mrf.mxu2 }
 0x341   :  { %v480_v53 = vmax.f32 %v477_v52, 0.0 }
 0x343   :  { %v483_v54 = vadd.f32 %v1028_v18, %v480_v53  ;;  %v583_v18 = vld [vmem:[#allocation3] sm:$0xff] }
 0x345   :  { %503 = vmatpush.msrb.mxu0 %v483_v54 }
 0x346   :  { %615 = vmatmul.msk.f32.vlgmr.msrb.gmra.mxu0 %vm147_vm7, %v484_v55  ;;  %vm513_vm7 = vcmask 1043456  }
 0x3c3   :  { %v505_v4 = vpop.f32.mrf.mxu0 }
 0x3c4   :  { %v509_v5 = vrot.slane %v505_v4, 4 }
 0x3c6   :  { %510 = vrot.lane.b32.xlu0 %v509_v5, %s922_s3 }
 0x438   :  { %v511_v13 = vpop.permute.xlu0 %510 }
 0x439   :  { %v514_v14 = vsel %vm513_vm7, %v505_v4, %v511_v13 }
 0x43a   :  { %616 = vmatmul.msk.f32.vlgmr.msra.gmra.mxu3 %vm537_vm9, %v514_v14 }
 0x442   :  { %617 = vmatmul.msk.f32.vlgmr.msrb.gmra.mxu3 %vm537_vm9, %v514_v14 }
 0x4bd   :  { %v558_v16 = vpop.f32.mrf.mxu3 }
 0x4be   :  { %v559_v17 = vadd.f32 %v558_v16, %v535_v15 }
 0x4c0   :  { %v581_v0 = vmax.f32 %v559_v17, 0.0 }
 0x4c2   :  { %v585_v19 = vadd.f32 %v583_v18, %v581_v0 }
 0x4c4   :  { %587 = vst [vmem:[#allocation15] sm:$0xff] %v585_v19 }
 0x4c5   :  { %v578_v20 = vpop.f32.mrf.mxu3 }
 0x4c6   :  { %v579_v21 = vadd.f32 %v578_v20, %v535_v15 }
 0x4c8   :  { %v582_v23 = vmax.f32 %v579_v21, 0.0 }
 0x4ca   :  { %v586_v24 = vadd.f32 %v584_v22, %v582_v23 }
 0x4cc   :  { %588 = vst [vmem:[#allocation15 + $0x8] sm:$0xff] %v586_v24 }
 0x4cd   :  { %599 = dma.vmem_to_hbm [thread:$0]  %s595_s21, 256, %s597_s8, [#allocation5]  }
 0x4ce   :  { %885 = dma.done.wait [#allocation5], 256  }
 0x4cf   :  { %886 = vsyncadd [#allocation5], 4294967040 }
 0x4d0   :  { %604 = vsyncpa [#allocation4], 1 }
 0x4d1   :  { %605 = vsyncpa [#allocation7], 1 }
 0x4d2   :  { %606 = vsyncpa [#allocation10], 1 }
 0x4d3   :  { %607 = vsyncpa [#allocation13], 1 }
 0x4d4   :  { %608 = vsyncpa [#allocation5], 1 }

</bundles_post_ra>
